<compile_context>
chip_gen: v5e
topology: v5e:2x2
jax: 0.10.0
libtpu: 0.0.40
codegen_flags: <defaults>
</compile_context>

<pallas_src>
import functools

import jax
import jax.numpy as jnp
from jax.experimental import pallas as pl
from jax.experimental.pallas import tpu as pltpu


# ----------------------------------------------------------------------------
# Plain-JAX glue: FPS, gather, ball query, grouping
# ----------------------------------------------------------------------------
def furthest_point_sample(pos, n_samples):
    """pos: (B, N, 3) -> (B, n_samples) int32 indices (first index is 0, like pointnet2)."""
    B, N, _ = pos.shape

    def one(p):  # p: (N, 3)
        def body(i, carry):
            idxs, mind, last = carry
            d = jnp.sum((p - p[last]) ** 2, axis=-1)
            mind = jnp.minimum(mind, d)
            nxt = jnp.argmax(mind).astype(jnp.int32)
            idxs = idxs.at[i].set(nxt)
            return idxs, mind, nxt

        idxs = jnp.zeros((n_samples,), jnp.int32)
        mind = jnp.full((N,), 1e10, jnp.float32)
        idxs, _, _ = jax.lax.fori_loop(1, n_samples, body, (idxs, mind, jnp.int32(0)))
        return idxs

    return jax.vmap(one)(pos)


def ball_query(new_xyz, xyz, radius, n_samples):
    """new_xyz: (B,S,3), xyz: (B,N,3) -> (B,S,n_samples) int32 indices.

    Matches pointnet2 ball_query semantics: first `n_samples` in-radius indices in
    ascending order, remaining slots padded with the first in-radius index.
    """
    N = xyz.shape[1]
    d2 = jnp.sum((new_xyz[:, :, None, :] - xyz[:, None, :, :]) ** 2, axis=-1)  # (B,S,N)
    in_ball = d2 < radius * radius
    cand = jnp.where(in_ball, jnp.arange(N, dtype=jnp.int32)[None, None, :], N)
    cand = jnp.sort(cand, axis=-1)[:, :, :n_samples]                            # (B,S,K)
    first = cand[:, :, :1]
    idx = jnp.where(cand == N, first, cand)
    idx = jnp.where(idx == N, 0, idx)  # safety fallback (center is always in-radius)
    return idx.astype(jnp.int32)


def group(pos, new_xyz, features, idx):
    """pos (B,N,3), new_xyz (B,S,3), features (B,C,N), idx (B,S,K) -> (B,S,K,3+C)."""
    gather_pts = jax.vmap(lambda p, i: p[i])          # (N,D), (S,K) -> (S,K,D)
    grouped_xyz = gather_pts(pos, idx) - new_xyz[:, :, None, :]        # (B,S,K,3) relative
    feat = jnp.transpose(features, (0, 2, 1))                          # (B,N,C)
    grouped_feat = gather_pts(feat, idx)                               # (B,S,K,C)
    return jnp.concatenate([grouped_xyz, grouped_feat], axis=-1)       # (B,S,K,3+C)


# ----------------------------------------------------------------------------
# Pallas kernel: shared MLP (fused 1x1-conv/BN/ReLU stack) + max-pool over K
# ----------------------------------------------------------------------------
def _round_up(x, m):
    return (x + m - 1) // m * m


def _make_mlp_maxpool_kernel(n_layers):
    def kernel(*refs):
        x_ref = refs[0]          # (tile_p * K, C0_pad)  bf16, tile-local k-major rows
        o_ref = refs[-1]         # (tile_p, C_out_pad)   f32, lane-dense (mult of 128)
        wb = refs[1:-1]
        tile_p = o_ref.shape[0]
        K = x_ref.shape[0] // tile_p

        h = x_ref[...]                                   # bf16 block, no reshape
        for l in range(n_layers):
            w = wb[2 * l][...]                           # (C_in, C_out)  bf16
            b = wb[2 * l + 1][...]                       # (1, C_out)     f32
            acc = jnp.dot(h.astype(w.dtype), w,
                          preferred_element_type=jnp.float32)   # MXU, f32 accumulate
            h = jnp.maximum(acc + b, 0.0)                # f32 epilogue on the VPU

        # Max-pool over the K neighbours: rows are k-major, so this is an unrolled
        # jnp.maximum over K contiguous, sublane-aligned (tile_p, C_out) slabs.
        m = h[0:tile_p]
        for k in range(1, K):
            m = jnp.maximum(m, h[k * tile_p:(k + 1) * tile_p])
        o_ref[...] = m

    return kernel


def mlp_maxpool_pallas(x, weights, biases, *, tile_p_max=1024):
    """x: (P, K, C0) float -> (P, C_out_last) f32 via fused shared-MLP + max over K."""
    P, K, C0 = x.shape
    n_layers = len(weights)
    C_last = weights[-1].shape[-1]

    # Channel padding: first-layer C_in -> multiple of 8; last-layer C_out -> multiple
    # of 128 so the output store is a lane-dense unmasked vst.
    C0_pad = _round_up(C0, 8)
    C_out_pad = _round_up(C_last, 128)

    # Tile selection: multiple of 8, as large as the cap allows, and >= 2 grid steps
    # when P permits (keeps both v7x TensorCores busy under "parallel" semantics).
    tile_p = max(8, min(tile_p_max, _round_up(pl.cdiv(P, 2), 8)))
    P_pad = _round_up(P, tile_p)
    n_tiles = P_pad // tile_p

    # Wrapper-side layout plumbing (not in-kernel): bf16 cast + zero-pad + tile-local
    # k-major ordering so the kernel never reshapes or relayouts.
    xp = jnp.pad(x.astype(jnp.bfloat16),
                 ((0, P_pad - P), (0, 0), (0, C0_pad - C0)))
    xp = xp.reshape(n_tiles, tile_p, K, C0_pad)
    xp = jnp.transpose(xp, (0, 2, 1, 3)).reshape(P_pad * K, C0_pad)

    # Fold the channel padding into the weights/biases with zeros (exact same math),
    # bf16 weights for the MXU, f32 biases for the epilogue.
    ws, bs = [], []
    for l, (w, b) in enumerate(zip(weights, biases)):
        ci, co = w.shape
        ci_p = C0_pad if l == 0 else ci
        co_p = C_out_pad if l == n_layers - 1 else co
        wp = jnp.zeros((ci_p, co_p), jnp.float32).at[:ci, :co].set(w)
        bp = jnp.zeros((1, co_p), jnp.float32).at[:, :co].set(jnp.reshape(b, (1, -1)))
        ws.append(wp.astype(jnp.bfloat16))
        bs.append(bp)

    in_specs = [pl.BlockSpec((tile_p * K, C0_pad), lambda i: (i, 0))]
    args = [xp]
    for w, b in zip(ws, bs):
        in_specs.append(pl.BlockSpec(w.shape, lambda i: (0, 0)))
        in_specs.append(pl.BlockSpec(b.shape, lambda i: (0, 0)))
        args += [w, b]

    out = pl.pallas_call(
        _make_mlp_maxpool_kernel(n_layers),
        out_shape=jax.ShapeDtypeStruct((P_pad, C_out_pad), jnp.float32),
        grid=(n_tiles,),
        in_specs=in_specs,
        out_specs=pl.BlockSpec((tile_p, C_out_pad), lambda i: (i, 0)),
        compiler_params=pltpu.CompilerParams(
            dimension_semantics=("parallel",)),
    )(*args)
    return out[:P, :C_last]


# ----------------------------------------------------------------------------
# SetConvLayer forward
# ----------------------------------------------------------------------------
def set_conv_layer_forward(pos, features, params, *, sample_rate, radius, n_samples):
    """pos: (B,N,3) f32, features: (B,C,N) f32.

    Returns (new_xyz (B,S,3), new_features (B, mlp[-1], S)) with S = int(N*sample_rate).
    """
    B, N, _ = pos.shape
    S = int(N * sample_rate)

    # 1-2. FPS + gather region centers
    fps_idx = furthest_point_sample(pos, S)                     # (B,S)
    new_xyz = jax.vmap(lambda p, i: p[i])(pos, fps_idx)         # (B,S,3)

    # 3. ball query + grouping (use_xyz=True -> concat relative xyz)
    idx = ball_query(new_xyz, pos, radius, n_samples)           # (B,S,K)
    grouped = group(pos, new_xyz, features, idx)                # (B,S,K,3+C)

    # 4. fused shared-MLP + max-pool in the Pallas kernel
    K = n_samples
    C0 = grouped.shape[-1]
    x = grouped.reshape(B * S, K, C0).astype(jnp.float32)
    out = mlp_maxpool_pallas(x, params["weights"], params["biases"])
    new_features = jnp.transpose(out.reshape(B, S, -1), (0, 2, 1))  # (B, mlp[-1], S)
    return new_xyz, new_features


def init_params(key, mlp_channels):
    """Deterministic init of the shared-MLP (Conv2d 1x1, no bias) + BN(eval) params,
    folded into effective (W, b) per layer."""
    weights, biases = [], []
    for l in range(1, len(mlp_channels)):
        c_in, c_out = mlp_channels[l - 1], mlp_channels[l]
        key, k1, k2, k3 = jax.random.split(key, 4)
        w = jax.random.normal(k1, (c_in, c_out), jnp.float32) * 0.2   # conv weight (transposed)
        gamma = 0.5 + jax.random.uniform(k2, (c_out,), jnp.float32)   # BN weight
        beta = jax.random.normal(k3, (c_out,), jnp.float32) * 0.1     # BN bias
        # eval-mode BN fold: running_mean=0, running_var=1, eps=1e-5
        scale = gamma / jnp.sqrt(1.0 + 1e-5)
        weights.append(w * scale[None, :])
        biases.append(beta[None, :])
    return {"weights": weights, "biases": biases}


# ----------------------------------------------------------------------------
# Pure-JAX reference (mirrors the kernel's bf16-matmul / f32-accumulate numerics)
# ----------------------------------------------------------------------------
def _mlp_maxpool_ref(x, weights, biases):
    P, K, C0 = x.shape
    h = x.astype(jnp.bfloat16).reshape(P * K, C0)
    for w, b in zip(weights, biases):
        acc = jnp.dot(h.astype(jnp.bfloat16), w.astype(jnp.bfloat16),
                      preferred_element_type=jnp.float32)
        h = jnp.maximum(acc + jnp.reshape(b, (1, -1)), 0.0)
    return jnp.max(h.reshape(P, K, -1), axis=1)


if __name__ == "__main__":
    # Module config (small, consistent with SetConvLayer(sample_rate, radius, n_samples, mlp)):
    B, N, C = 2, 16, 4
    sample_rate, radius, n_samples = 0.5, 0.75, 8
    mlp = [C, 32, 32, 64]
    mlp = [mlp[0] + 3] + mlp[1:]   # use_xyz=True -> mlp[0] += 3

    key = jax.random.PRNGKey(0)
    k_pos, k_feat, k_par, k_extra = jax.random.split(key, 4)
    pos = jax.random.uniform(k_pos, (B, N, 3), jnp.float32)           # (B, N, 3)
    features = jax.random.normal(k_feat, (B, C, N), jnp.float32)      # (B, C, N)
    params = init_params(k_par, mlp)

    fwd = functools.partial(set_conv_layer_forward,
                            sample_rate=sample_rate, radius=radius, n_samples=n_samples)
    new_xyz, new_features = jax.jit(fwd)(pos, features, params)
    jax.block_until_ready((new_xyz, new_features))

    S = int(N * sample_rate)
    assert new_xyz.shape == (B, S, 3)
    assert new_features.shape == (B, mlp[-1], S)

    # Sanity check the Pallas hot path against the pure-JAX reference.
    fps_idx = furthest_point_sample(pos, S)
    centers = jax.vmap(lambda p, i: p[i])(pos, fps_idx)
    idx = ball_query(centers, pos, radius, n_samples)
    grouped = group(pos, centers, features, idx).reshape(B * S, n_samples, mlp[0])
    ref = _mlp_maxpool_ref(grouped, params["weights"], params["biases"])
    got = jnp.transpose(new_features, (0, 2, 1)).reshape(B * S, mlp[-1])
    assert jnp.allclose(got, ref, atol=1e-3, rtol=1e-3), "Pallas output mismatch"

    # Extra robustness check: P not a multiple of the tile (exercises row padding).
    P_odd = 13
    x_odd = jax.random.normal(k_extra, (P_odd, n_samples, mlp[0]), jnp.float32)
    got_odd = mlp_maxpool_pallas(x_odd, params["weights"], params["biases"])
    ref_odd = _mlp_maxpool_ref(x_odd, params["weights"], params["biases"])
    jax.block_until_ready((got_odd, ref_odd))
    assert got_odd.shape == (P_odd, mlp[-1])
    assert jnp.allclose(got_odd, ref_odd, atol=1e-3, rtol=1e-3), "Pallas padded-P mismatch"

    print("KERNEL_OK")
</pallas_src>

<mosaic_0001>
module attributes {stable_mosaic.version = 11 : i64} {
  func.func @kernel(%arg0: i32, %arg1: memref<64x8xbf16, #tpu.memory_space<vmem>>, %arg2: memref<8x32xbf16, #tpu.memory_space<vmem>>, %arg3: memref<1x32xf32, #tpu.memory_space<vmem>>, %arg4: memref<32x32xbf16, #tpu.memory_space<vmem>>, %arg5: memref<1x32xf32, #tpu.memory_space<vmem>>, %arg6: memref<32x128xbf16, #tpu.memory_space<vmem>>, %arg7: memref<1x128xf32, #tpu.memory_space<vmem>>, %arg8: memref<8x128xf32, #tpu.memory_space<vmem>>) attributes {dimension_semantics = [#tpu.dimension_semantics<parallel>], iteration_bounds = array<i64: 2>, scalar_prefetch = 0 : i64, scratch_operands = 0 : i64, tpu.core_type = #tpu.core_type<tc>, window_params = [{transform_indices = @transform_0, window_bounds = array<i64: 64, 8>}, {pipeline_mode = #tpu.pipeline_mode<synchronous>, transform_indices = @transform_1, window_bounds = array<i64: 8, 32>}, {pipeline_mode = #tpu.pipeline_mode<synchronous>, transform_indices = @transform_2, window_bounds = array<i64: 1, 32>}, {pipeline_mode = #tpu.pipeline_mode<synchronous>, transform_indices = @transform_3, window_bounds = array<i64: 32, 32>}, {pipeline_mode = #tpu.pipeline_mode<synchronous>, transform_indices = @transform_4, window_bounds = array<i64: 1, 32>}, {pipeline_mode = #tpu.pipeline_mode<synchronous>, transform_indices = @transform_5, window_bounds = array<i64: 32, 128>}, {pipeline_mode = #tpu.pipeline_mode<synchronous>, transform_indices = @transform_6, window_bounds = array<i64: 1, 128>}, {transform_indices = @transform_7, window_bounds = array<i64: 8, 128>}]} {
    %c0 = arith.constant 0 : index
    %c0_0 = arith.constant 0 : index
    %0 = vector.load %arg1[%c0, %c0_0] : memref<64x8xbf16, #tpu.memory_space<vmem>>, vector<64x8xbf16>
    %c0_1 = arith.constant 0 : index
    %c0_2 = arith.constant 0 : index
    %1 = vector.load %arg2[%c0_1, %c0_2] : memref<8x32xbf16, #tpu.memory_space<vmem>>, vector<8x32xbf16>
    %c0_3 = arith.constant 0 : index
    %c0_4 = arith.constant 0 : index
    %2 = vector.load %arg3[%c0_3, %c0_4] : memref<1x32xf32, #tpu.memory_space<vmem>>, vector<1x32xf32>
    %cst = arith.constant dense<0.000000e+00> : vector<64x32xf32>
    %3 = tpu.matmul %0, %1, %cst {dimension_numbers = #tpu.dot_dimension_numbers<[1], [0], [0], [1], [0, 0, 1, 1], [], []>} : vector<64x8xbf16>, vector<8x32xbf16>, vector<64x32xf32> -> vector<64x32xf32>
    %4 = vector.broadcast %2 : vector<1x32xf32> to vector<64x32xf32>
    %5 = arith.addf %3, %4 : vector<64x32xf32>
    %cst_5 = arith.constant 0.000000e+00 : f32
    %6 = vector.broadcast %cst_5 : f32 to vector<64x32xf32>
    %7 = arith.maximumf %5, %6 : vector<64x32xf32>
    %c0_6 = arith.constant 0 : index
    %c0_7 = arith.constant 0 : index
    %8 = vector.load %arg4[%c0_6, %c0_7] : memref<32x32xbf16, #tpu.memory_space<vmem>>, vector<32x32xbf16>
    %c0_8 = arith.constant 0 : index
    %c0_9 = arith.constant 0 : index
    %9 = vector.load %arg5[%c0_8, %c0_9] : memref<1x32xf32, #tpu.memory_space<vmem>>, vector<1x32xf32>
    %10 = arith.truncf %7 : vector<64x32xf32> to vector<64x32xbf16>
    %cst_10 = arith.constant dense<0.000000e+00> : vector<64x32xf32>
    %11 = tpu.matmul %10, %8, %cst_10 {dimension_numbers = #tpu.dot_dimension_numbers<[1], [0], [0], [1], [0, 0, 1, 1], [], []>} : vector<64x32xbf16>, vector<32x32xbf16>, vector<64x32xf32> -> vector<64x32xf32>
    %12 = vector.broadcast %9 : vector<1x32xf32> to vector<64x32xf32>
    %13 = arith.addf %11, %12 : vector<64x32xf32>
    %cst_11 = arith.constant 0.000000e+00 : f32
    %14 = vector.broadcast %cst_11 : f32 to vector<64x32xf32>
    %15 = arith.maximumf %13, %14 : vector<64x32xf32>
    %c0_12 = arith.constant 0 : index
    %c0_13 = arith.constant 0 : index
    %16 = vector.load %arg6[%c0_12, %c0_13] : memref<32x128xbf16, #tpu.memory_space<vmem>>, vector<32x128xbf16>
    %c0_14 = arith.constant 0 : index
    %c0_15 = arith.constant 0 : index
    %17 = vector.load %arg7[%c0_14, %c0_15] : memref<1x128xf32, #tpu.memory_space<vmem>>, vector<1x128xf32>
    %18 = arith.truncf %15 : vector<64x32xf32> to vector<64x32xbf16>
    %cst_16 = arith.constant dense<0.000000e+00> : vector<64x128xf32>
    %19 = tpu.matmul %18, %16, %cst_16 {dimension_numbers = #tpu.dot_dimension_numbers<[1], [0], [0], [1], [0, 0, 1, 1], [], []>} : vector<64x32xbf16>, vector<32x128xbf16>, vector<64x128xf32> -> vector<64x128xf32>
    %20 = vector.broadcast %17 : vector<1x128xf32> to vector<64x128xf32>
    %21 = arith.addf %19, %20 : vector<64x128xf32>
    %cst_17 = arith.constant 0.000000e+00 : f32
    %22 = vector.broadcast %cst_17 : f32 to vector<64x128xf32>
    %23 = arith.maximumf %21, %22 : vector<64x128xf32>
    %24 = vector.extract_strided_slice %23 {offsets = [0, 0], sizes = [8, 128], strides = [1, 1]} : vector<64x128xf32> to vector<8x128xf32>
    %25 = vector.extract_strided_slice %23 {offsets = [8, 0], sizes = [8, 128], strides = [1, 1]} : vector<64x128xf32> to vector<8x128xf32>
    %26 = arith.maximumf %24, %25 : vector<8x128xf32>
    %27 = vector.extract_strided_slice %23 {offsets = [16, 0], sizes = [8, 128], strides = [1, 1]} : vector<64x128xf32> to vector<8x128xf32>
    %28 = arith.maximumf %26, %27 : vector<8x128xf32>
    %29 = vector.extract_strided_slice %23 {offsets = [24, 0], sizes = [8, 128], strides = [1, 1]} : vector<64x128xf32> to vector<8x128xf32>
    %30 = arith.maximumf %28, %29 : vector<8x128xf32>
    %31 = vector.extract_strided_slice %23 {offsets = [32, 0], sizes = [8, 128], strides = [1, 1]} : vector<64x128xf32> to vector<8x128xf32>
    %32 = arith.maximumf %30, %31 : vector<8x128xf32>
    %33 = vector.extract_strided_slice %23 {offsets = [40, 0], sizes = [8, 128], strides = [1, 1]} : vector<64x128xf32> to vector<8x128xf32>
    %34 = arith.maximumf %32, %33 : vector<8x128xf32>
    %35 = vector.extract_strided_slice %23 {offsets = [48, 0], sizes = [8, 128], strides = [1, 1]} : vector<64x128xf32> to vector<8x128xf32>
    %36 = arith.maximumf %34, %35 : vector<8x128xf32>
    %37 = vector.extract_strided_slice %23 {offsets = [56, 0], sizes = [8, 128], strides = [1, 1]} : vector<64x128xf32> to vector<8x128xf32>
    %38 = arith.maximumf %36, %37 : vector<8x128xf32>
    %c0_18 = arith.constant 0 : index
    %c0_19 = arith.constant 0 : index
    %39 = vector.load %arg8[%c0_18, %c0_19] : memref<8x128xf32, #tpu.memory_space<vmem>>, vector<8x128xf32>
    tpu.vector_store %arg8[%c0_18, %c0_19], %38 {strides = array<i32>} : memref<8x128xf32, #tpu.memory_space<vmem>>, vector<8x128xf32>,
    return
  }
  func.func @transform_0(%arg0: i32) -> (i32, i32) {
    %c0_i32 = arith.constant 0 : i32
    %c0_i32_0 = arith.constant 0 : i32
    return %arg0, %c0_i32 : i32, i32
  }
  func.func @transform_1(%arg0: i32) -> (i32, i32) {
    %c0_i32 = arith.constant 0 : i32
    %c0_i32_0 = arith.constant 0 : i32
    %c0_i32_1 = arith.constant 0 : i32
    return %c0_i32, %c0_i32_0 : i32, i32
  }
  func.func @transform_2(%arg0: i32) -> (i32, i32) {
    %c0_i32 = arith.constant 0 : i32
    %c0_i32_0 = arith.constant 0 : i32
    %c0_i32_1 = arith.constant 0 : i32
    return %c0_i32, %c0_i32_0 : i32, i32
  }
  func.func @transform_3(%arg0: i32) -> (i32, i32) {
    %c0_i32 = arith.constant 0 : i32
    %c0_i32_0 = arith.constant 0 : i32
    %c0_i32_1 = arith.constant 0 : i32
    return %c0_i32, %c0_i32_0 : i32, i32
  }
  func.func @transform_4(%arg0: i32) -> (i32, i32) {
    %c0_i32 = arith.constant 0 : i32
    %c0_i32_0 = arith.constant 0 : i32
    %c0_i32_1 = arith.constant 0 : i32
    return %c0_i32, %c0_i32_0 : i32, i32
  }
  func.func @transform_5(%arg0: i32) -> (i32, i32) {
    %c0_i32 = arith.constant 0 : i32
    %c0_i32_0 = arith.constant 0 : i32
    %c0_i32_1 = arith.constant 0 : i32
    return %c0_i32, %c0_i32_0 : i32, i32
  }
  func.func @transform_6(%arg0: i32) -> (i32, i32) {
    %c0_i32 = arith.constant 0 : i32
    %c0_i32_0 = arith.constant 0 : i32
    %c0_i32_1 = arith.constant 0 : i32
    return %c0_i32, %c0_i32_0 : i32, i32
  }
  func.func @transform_7(%arg0: i32) -> (i32, i32) {
    %c0_i32 = arith.constant 0 : i32
    %c0_i32_0 = arith.constant 0 : i32
    return %arg0, %c0_i32 : i32, i32
  }
}

</mosaic_0001>

<bundles_post_ra>
// kernel: custom-call.8
= control target key start
LH: loop header
LB: loop body
LE: loop exit
PB: predicated region body
PF: predicated region fallthrough
CT: control target
= control target key end

     0   :  { %s6_s0 = inlined_call_operand.vmem [shape: f32[2,16], index: 0, kind: output, shape index: {}]  }

// kernel: set_conv_layer_forward.1
= control target key start
LH: loop header
LB: loop body
LE: loop exit
PB: predicated region body
PF: predicated region fallthrough
CT: control target
= control target key end

     0   :  { %s700_s24 = smov 0   ;;  %s754_s0 = inlined_call_operand.vmem [shape: bf16[128,8], index: 0, kind: input, shape index: {}]   ;;  %s755_s1 = inlined_call_operand.vmem [shape: bf16[8,32], index: 1, kind: input, shape index: {}]   ;;  %s756_s2 = inlined_call_operand.vmem [shape: f32[1,32], index: 2, kind: input, shape index: {}]   ;;  %s757_s3 = inlined_call_operand.vmem [shape: bf16[32,32], index: 3, kind: input, shape index: {}]   ;;  %s758_s4 = inlined_call_operand.vmem [shape: f32[1,32], index: 4, kind: input, shape index: {}]   ;;  %s759_s5 = inlined_call_operand.vmem [shape: bf16[32,128], index: 5, kind: input, shape index: {}]   ;;  %s760_s6 = inlined_call_operand.vmem [shape: f32[1,128], index: 6, kind: input, shape index: {}]   ;;  %s761_s7 = inlined_call_operand.vmem [shape: f32[16,128], index: 7, kind: output, shape index: {}]  }
   0x1 LB: > { %s706_s25 = sadd.s32 4294967295, %s658_s24   ;;  %p579_p0 = scmp.ge.s32.totalorder %s658_s24, 1  ;;  %s658_s24 = sphi %s700_s24, %s17_s24  }
   0x2   : > { %p238_p1 = scmp.lt.s32.totalorder %s658_s24, 3 }
   0x4   : > { %p239_p2 = pnand %p579_p0, %p238_p1 }
   0x5   : > { %s580_s28 = sshll.u32 (!%p239_p2), %s706_s25, 3  ;;  %p275_p4 = scmp.lt.s32.totalorder (!%p239_p2), %s706_s25, 1 }
   0x6   : > { %242 = sbr.rel (%p239_p2) target bundleno = 497 (0x1f1), region = 48  ;;  %p270_p3 = scmp.lt.s32.totalorder (!%p239_p2), %s580_s28, 15 }
   0xb   : > { %v288_v0 = vld [vmem:[%s755_s1] sm:$0xf]  ;;  %vm326_vm0 = vcmask 1043456   ;;  %s763_s28 = smov (!%p270_p3, %s580_s28), 15  ;;  %vm313_vm1 = vcmask 64512   ;;  %v634_v6 = vld [vmem:[%s757_s3 + $0x8] sm:$0xff] }
   0xc   : > { %v328_v1 = vsel %vm326_vm0, %v288_v0, 0  ;;  %s581_s29 = sshll.u32 %s763_s28, 2  ;;  %410 = vmatpush.bf16.msra.mxu1 %v634_v6  ;;  %637 = vmatpush.bf16.msra.mxu3 %v634_v6  ;;  %v633_v7 = vld [vmem:[%s757_s3] sm:$0xff]  ;;  %vm391_vm2 = vcmask 261120   ;;  %v636_v37 = vld [vmem:[%s759_s5 + $0x8] sm:$0xff]  ;;  %s765_s25 = smov (!%p275_p4, %s706_s25), 1 }
   0xd   : > { %337 = vmatpush.bf16.msra.mxu0 %v328_v1  ;;  %s273_s9 = scalar_lea.vmem %s754_s0, %s581_s29  ;;  %v649_v9 = vld [vmem:[%s756_s2] ss:$0 sm:$0xff]  ;;  %639 = vmatpush.bf16.msra.mxu2 %v636_v37  ;;  %s582_s26 = sshll.u32 %s765_s25, 3 }
   0xe   : > { %v629_v2 = vld [vmem:[%s273_s9] sm:$0xff]  ;;  %v630_v3 = vld [vmem:[%s273_s9 + $0x8] sm:$0xff]  ;;  %v631_v4 = vld [vmem:[%s273_s9 + $0x10] sm:$0xff]  ;;  %s278_s29 = scalar_lea.vmem %s761_s7, %s582_s26 }
   0xf   : > { %v632_v5 = vld [vmem:[%s273_s9 + $0x18] sm:$0xff]  ;;  %v635_v38 = vld [vmem:[%s759_s5] sm:$0xff] }
  0x10   : > { %599 = vmatmul.msk.bf16.vlgmr.msra.gmra.mxu0 %vm313_vm1, %v629_v2  ;;  %411 = vmatpush.bf16.msra.mxu1 %v633_v7  ;;  %v650_v40 = vld [vmem:[%s758_s4] ss:$0 sm:$0xff] }
  0x11   : > { %638 = vmatpush.bf16.msra.mxu3 %v633_v7  ;;  %640 = vmatpush.bf16.msra.mxu2 %v635_v38 }
  0x14   : > { %483 = vmatpush.bf16.msrb.mxu1 %v636_v37 }
  0x18   : > { %484 = vmatpush.bf16.msrb.mxu1 %v635_v38 }
  0x20   : > { %600 = vmatmul.msk.bf16.gmra.mxu0 %vm313_vm1, %v630_v3 }
  0x30   : > { %601 = vmatmul.msk.bf16.gmra.mxu0 %vm313_vm1, %v631_v4 }
  0x40   : > { %602 = vmatmul.msk.bf16.gmra.mxu0 %vm313_vm1, %v632_v5 }
  0x8d   : > { %v339_v8 = vpop.f32.mrf.mxu0 }
  0x8e   : > { %v340_v10 = vadd.f32 %v649_v9, %v339_v8 }
  0x90   : > { %v359_v13 = vmax.f32 %v340_v10, 0.0 }
  0x95   : > { %v341_v11 = vpop.f32.mrf.mxu0 }
  0x96   : > { %v342_v12 = vadd.f32 %v649_v9, %v341_v11 }
  0x98   : > { %v360_v14 = vmax.f32 %v342_v12, 0.0 }
  0x9a   : > { %v372_v15 = vpack.c.bf16 %v360_v14, %v359_v13 }
  0x9c   : > { %611 = vmatmul.msk.bf16.vlgmr.msra.gmra.mxu1 %vm391_vm2, %v372_v15 }
  0x9d   : > { %v344_v16 = vpop.f32.mrf.mxu0 }
  0x9e   : > { %v345_v17 = vadd.f32 %v649_v9, %v344_v16 }
  0xa0   : > { %v361_v20 = vmax.f32 %v345_v17, 0.0 }
  0xa5   : > { %v346_v18 = vpop.f32.mrf.mxu0 }
  0xa6   : > { %v347_v19 = vadd.f32 %v649_v9, %v346_v18 }
  0xa8   : > { %v362_v21 = vmax.f32 %v347_v19, 0.0 }
  0xaa   : > { %v373_v22 = vpack.c.bf16 %v362_v21, %v361_v20 }
  0xac   : > { %612 = vmatmul.msk.bf16.vlgmr.msra.gmra.mxu3 %vm391_vm2, %v373_v22 }
  0xad   : > { %v349_v23 = vpop.f32.mrf.mxu0 }
  0xae   : > { %v350_v24 = vadd.f32 %v649_v9, %v349_v23 }
  0xb0   : > { %v363_v27 = vmax.f32 %v350_v24, 0.0 }
  0xb5   : > { %v351_v25 = vpop.f32.mrf.mxu0 }
  0xb6   : > { %v352_v26 = vadd.f32 %v649_v9, %v351_v25 }
  0xb8   : > { %v364_v28 = vmax.f32 %v352_v26, 0.0 }
  0xba   : > { %v374_v29 = vpack.c.bf16 %v364_v28, %v363_v27 }
  0xbc   : > { %613 = vmatmul.msk.bf16.gmra.mxu3 %vm391_vm2, %v374_v29 }
  0xbd   : > { %v354_v30 = vpop.f32.mrf.mxu0 }
  0xbe   : > { %v355_v31 = vadd.f32 %v649_v9, %v354_v30 }
  0xc0   : > { %v365_v34 = vmax.f32 %v355_v31, 0.0 }
  0xc5   : > { %v356_v32 = vpop.f32.mrf.mxu0 }
  0xc6   : > { %v357_v33 = vadd.f32 %v649_v9, %v356_v32  ;;  %v651_v9 = vld [vmem:[%s760_s6] ss:$0 sm:$0xff] }
  0xc8   : > { %v366_v35 = vmax.f32 %v357_v33, 0.0 }
  0xca   : > { %v375_v36 = vpack.c.bf16 %v366_v35, %v365_v34 }
  0xcc   : > { %614 = vmatmul.msk.bf16.gmra.mxu3 %vm391_vm2, %v375_v36 }
 0x119   : > { %v413_v39 = vpop.f32.mrf.mxu1 }
 0x11a   : > { %v414_v41 = vadd.f32 %v650_v40, %v413_v39 }
 0x11c   : > { %v433_v44 = vmax.f32 %v414_v41, 0.0 }
 0x121   : > { %v415_v42 = vpop.f32.mrf.mxu1 }
 0x122   : > { %v416_v43 = vadd.f32 %v650_v40, %v415_v42 }
 0x124   : > { %v434_v45 = vmax.f32 %v416_v43, 0.0 }
 0x126   : > { %v446_v46 = vpack.c.bf16 %v434_v45, %v433_v44 }
 0x128   : > { %623 = vmatmul.msk.bf16.vlgmr.msrb.gmra.mxu1 %vm391_vm2, %v446_v46 }
 0x12f   : > { %v418_v47 = vpop.f32.mrf.mxu3 }
 0x130   : > { %v419_v48 = vadd.f32 %v650_v40, %v418_v47 }
 0x132   : > { %v435_v51 = vmax.f32 %v419_v48, 0.0 }
 0x137   : > { %v420_v49 = vpop.f32.mrf.mxu3 }
 0x138   : > { %v421_v50 = vadd.f32 %v650_v40, %v420_v49 }
 0x13a   : > { %v436_v52 = vmax.f32 %v421_v50, 0.0 }
 0x13c   : > { %v447_v53 = vpack.c.bf16 %v436_v52, %v435_v51 }
 0x13e   : > { %624 = vmatmul.msk.bf16.vlgmr.msra.gmra.mxu2 %vm391_vm2, %v447_v53 }
 0x13f   : > { %v423_v54 = vpop.f32.mrf.mxu3 }
 0x140   : > { %v424_v55 = vadd.f32 %v650_v40, %v423_v54 }
 0x142   : > { %v437_v58 = vmax.f32 %v424_v55, 0.0 }
 0x147   : > { %v425_v56 = vpop.f32.mrf.mxu3 }
 0x148   : > { %v426_v57 = vadd.f32 %v650_v40, %v425_v56 }
 0x14a   : > { %v438_v59 = vmax.f32 %v426_v57, 0.0 }
 0x14c   : > { %v448_v60 = vpack.c.bf16 %v438_v59, %v437_v58 }
 0x14e   : > { %625 = vmatmul.msk.bf16.gmra.mxu2 %vm391_vm2, %v448_v60 }
 0x14f   : > { %v428_v61 = vpop.f32.mrf.mxu3 }
 0x150   : > { %v429_v62 = vadd.f32 %v650_v40, %v428_v61 }
 0x152   : > { %v439_v1 = vmax.f32 %v429_v62, 0.0 }
 0x157   : > { %v430_v63 = vpop.f32.mrf.mxu3 }
 0x158   : > { %v431_v0 = vadd.f32 %v650_v40, %v430_v63 }
 0x15a   : > { %v440_v2 = vmax.f32 %v431_v0, 0.0 }
 0x15c   : > { %v449_v3 = vpack.c.bf16 %v440_v2, %v439_v1 }
 0x15e   : > { %626 = vmatmul.msk.bf16.gmra.mxu2 %vm391_vm2, %v449_v3 }
 0x1a5   : > { %v486_v6 = vpop.f32.mrf.mxu1 }
 0x1a6   : > { %v487_v12 = vadd.f32 %v651_v9, %v486_v6 }
 0x1a8   : > { %v506_v16 = vmax.f32 %v487_v12, 0.0 }
 0x1ad   : > { %v488_v8 = vpop.f32.mrf.mxu1 }
 0x1ae   : > { %v489_v11 = vadd.f32 %v651_v9, %v488_v8 }
 0x1b0   : > { %v507_v14 = vmax.f32 %v489_v11, 0.0 }
 0x1b2   : > { %v514_v20 = vmax.f32 %v506_v16, %v507_v14 }
 0x1c1   : > { %v491_v4 = vpop.f32.mrf.mxu2 }
 0x1c2   : > { %v492_v13 = vadd.f32 %v651_v9, %v491_v4 }
 0x1c4   : > { %v508_v17 = vmax.f32 %v492_v13, 0.0 }
 0x1c6   : > { %v515_v23 = vmax.f32 %v514_v20, %v508_v17 }
 0x1c9   : > { %v493_v5 = vpop.f32.mrf.mxu2 }
 0x1ca   : > { %v494_v15 = vadd.f32 %v651_v9, %v493_v5 }
 0x1cc   : > { %v509_v21 = vmax.f32 %v494_v15, 0.0 }
 0x1ce   : > { %v516_v26 = vmax.f32 %v515_v23, %v509_v21 }
 0x1d1   : > { %v496_v7 = vpop.f32.mrf.mxu2 }
 0x1d2   : > { %v497_v18 = vadd.f32 %v651_v9, %v496_v7 }
 0x1d4   : > { %v510_v24 = vmax.f32 %v497_v18, 0.0 }
 0x1d6   : > { %v517_v28 = vmax.f32 %v516_v26, %v510_v24 }
 0x1d9   : > { %v498_v10 = vpop.f32.mrf.mxu2 }
 0x1da   : > { %v499_v22 = vadd.f32 %v651_v9, %v498_v10 }
 0x1dc   : > { %v511_v27 = vmax.f32 %v499_v22, 0.0 }
 0x1de   : > { %v518_v31 = vmax.f32 %v517_v28, %v511_v27 }
 0x1e1   : > { %v501_v19 = vpop.f32.mrf.mxu2 }
 0x1e2   : > { %v502_v25 = vadd.f32 %v651_v9, %v501_v19 }
 0x1e4   : > { %v512_v29 = vmax.f32 %v502_v25, 0.0 }
 0x1e6   : > { %v519_v33 = vmax.f32 %v518_v31, %v512_v29 }
 0x1e9   : > { %v503_v30 = vpop.f32.mrf.mxu2 }
 0x1ea   : > { %v504_v32 = vadd.f32 %v651_v9, %v503_v30 }
 0x1ec   : > { %v513_v34 = vmax.f32 %v504_v32, 0.0 }
 0x1ee   : > { %v520_v35 = vmax.f32 %v519_v33, %v513_v34 }
 0x1f0   : > { %521 = vst [vmem:[%s278_s29] sm:$0xff] %v520_v35 }
 0x1f1 PF: > { %s17_s24 = sadd.s32 1, %s658_s24  }
 0x1f2   : > { %p14_p5 = scmp.ge.s32.totalorder %s17_s24, 4  }
 0x1f4   :  { %16 = sbr.rel (!%p14_p5) target bundleno = 1 (0x1), region = 78 }

</bundles_post_ra>
